<compile_context>
chip_gen: v5e
topology: v5e:2x2
jax: 0.10.0
libtpu: 0.0.40
codegen_flags: <defaults>
</compile_context>

<pallas_src>
import functools

import jax
import jax.numpy as jnp
from jax.experimental import pallas as pl
from jax.experimental.pallas import tpu as pltpu


CHUNK = 256  # K-chunk (rows of W1/W2) streamed per DMA; multiple of 8 sublanes.


def _round_up(n, m):
    return ((n + m - 1) // m) * m


def _make_kernel(tile_b, n_obs_p, hidden_p, n_act_p, chunk):
    n1 = n_obs_p // chunk   # K-chunks of W1 (over n_obs)
    n2 = hidden_p // chunk  # K-chunks of W2 (over hidden)

    def kernel(x_ref, w1_hbm, b1_ref, w2_hbm, b2_ref, w3_hbm, b3_ref, o_ref,
               w1_buf, w2_buf, w3_buf, w1_sem, w2_sem, w3_sem):
        # --- manual double-buffered weight streaming (HBM -> VMEM) ---
        def w1_copy(c, slot):
            return pltpu.make_async_copy(
                w1_hbm.at[pl.ds(c * chunk, chunk), :], w1_buf.at[slot], w1_sem.at[slot])

        def w2_copy(c, slot):
            return pltpu.make_async_copy(
                w2_hbm.at[pl.ds(c * chunk, chunk), :], w2_buf.at[slot], w2_sem.at[slot])

        w3_copy = pltpu.make_async_copy(w3_hbm, w3_buf, w3_sem.at[0])

        # Prime the pipeline: first chunk of W1 and W2 plus all of (small) W3 are
        # in flight before any compute; later chunks prefetch under the matmuls.
        w1_copy(0, 0).start()
        w2_copy(0, 0).start()
        w3_copy.start()

        # ---- Layer 1: x @ W1 + b1, ReLU (K streamed over n_obs chunks) ----
        acc = jnp.zeros((tile_b, hidden_p), jnp.float32)
        for c in range(n1):
            slot = c % 2
            w1_copy(c, slot).wait()
            if c + 1 < n1:
                w1_copy(c + 1, 1 - slot).start()
            xc = x_ref[:, pl.ds(c * chunk, chunk)]
            acc = acc + jnp.dot(xc, w1_buf[slot], preferred_element_type=jnp.float32)
        h = jnp.maximum(acc + b1_ref[...], 0.0).astype(jnp.bfloat16)

        # ---- Layer 2: h @ W2 + b2, ReLU (K streamed over hidden chunks) ----
        acc = jnp.zeros((tile_b, hidden_p), jnp.float32)
        for c in range(n2):
            slot = c % 2
            w2_copy(c, slot).wait()
            if c + 1 < n2:
                w2_copy(c + 1, 1 - slot).start()
            hc = h[:, c * chunk:(c + 1) * chunk]
            acc = acc + jnp.dot(hc, w2_buf[slot], preferred_element_type=jnp.float32)
        h2 = jnp.maximum(acc + b2_ref[...], 0.0).astype(jnp.bfloat16)

        # ---- Layer 3: h2 @ W3 + b3 ----
        w3_copy.wait()
        out = jnp.dot(h2, w3_buf[...], preferred_element_type=jnp.float32) + b3_ref[...]
        o_ref[...] = out.astype(o_ref.dtype)

    return kernel


def prepare_params(params, chunk=CHUNK):
    """Pad all dims to chunk/128 multiples and cast weights to bf16 (done once)."""
    w1, b1 = params["w1"], params["b1"]
    w2, b2 = params["w2"], params["b2"]
    w3, b3 = params["w3"], params["b3"]
    n_obs, hidden = w1.shape
    n_act = w3.shape[1]

    n_obs_p = _round_up(max(n_obs, chunk), chunk)
    hidden_p = _round_up(max(hidden, chunk), chunk)
    n_act_p = _round_up(max(n_act, 128), 128)

    bf16, f32 = jnp.bfloat16, jnp.float32
    # Padded rows/cols are zero weights + zero biases -> exact through both ReLUs.
    padded = {
        "w1": jnp.zeros((n_obs_p, hidden_p), bf16).at[:n_obs, :hidden].set(w1.astype(bf16)),
        "b1": jnp.zeros((1, hidden_p), f32).at[:, :hidden].set(b1.astype(f32)),
        "w2": jnp.zeros((hidden_p, hidden_p), bf16).at[:hidden, :hidden].set(w2.astype(bf16)),
        "b2": jnp.zeros((1, hidden_p), f32).at[:, :hidden].set(b2.astype(f32)),
        "w3": jnp.zeros((hidden_p, n_act_p), bf16).at[:hidden, :n_act].set(w3.astype(bf16)),
        "b3": jnp.zeros((1, n_act_p), f32).at[:, :n_act].set(b3.astype(f32)),
    }
    dims = (int(n_obs), int(hidden), int(n_act))
    return padded, dims


@functools.partial(jax.jit, static_argnames=("dims", "max_tile_b"))
def dqn_forward(x, padded, dims, max_tile_b=256):
    """x: (B, n_obs) float32; padded/dims: output of prepare_params."""
    n_obs, hidden, n_act = dims
    B = x.shape[0]
    assert x.shape[1] == n_obs

    w1p, b1p = padded["w1"], padded["b1"]
    w2p, b2p = padded["w2"], padded["b2"]
    w3p, b3p = padded["w3"], padded["b3"]
    n_obs_p, hidden_p = w1p.shape
    n_act_p = w3p.shape[1]
    chunk = CHUNK

    # Batch tiling: one grid step for typical DQN batches, 256-row tiles otherwise.
    # Multiple of 16 keeps bf16 sublane packing dense.
    tile_b = _round_up(min(B, max_tile_b), 16)
    num_tiles = pl.cdiv(B, tile_b)
    B_p = num_tiles * tile_b

    # Pad + cast activations (fuses with the producer under jit).
    xp = jnp.zeros((B_p, n_obs_p), jnp.bfloat16).at[:B, :n_obs].set(x.astype(jnp.bfloat16))

    # VMEM budget: only chunk-sized weight buffers are resident now.
    buf_bytes = (
        2 * tile_b * n_obs_p * 2                       # x tile, bf16, double-buffered
        + 2 * tile_b * n_act_p * 4                     # out tile, f32, double-buffered
        + 2 * (2 * hidden_p + n_act_p) * 4 * 2         # biases, f32, double-buffered
        + 2 * 2 * chunk * hidden_p * 2                 # W1/W2 chunk double-buffers, bf16
        + hidden_p * n_act_p * 2                       # W3 buffer, bf16
        + 2 * tile_b * hidden_p * (4 + 2)              # f32 acc + bf16 h per layer
    )
    try:
        cap = int(getattr(pltpu.get_tpu_info(), "vmem_capacity_bytes", 64 << 20))
    except Exception:
        cap = 64 << 20  # v7x floor
    vmem_limit = min(max(int(buf_bytes * 1.5), 32 << 20), max(cap - (8 << 20), 24 << 20))

    weight_bytes = (w1p.size + w2p.size + w3p.size) * 2 + (b1p.size + b2p.size + b3p.size) * 4
    flops = 2 * B_p * (n_obs_p * hidden_p + hidden_p * hidden_p + hidden_p * n_act_p)
    bytes_accessed = xp.size * 2 + num_tiles * weight_bytes + B_p * n_act_p * 4
    cost = pl.CostEstimate(flops=flops, transcendentals=0, bytes_accessed=bytes_accessed)

    kernel = _make_kernel(tile_b, n_obs_p, hidden_p, n_act_p, chunk)

    out_p = pl.pallas_call(
        kernel,
        out_shape=jax.ShapeDtypeStruct((B_p, n_act_p), jnp.float32),
        grid_spec=pltpu.PrefetchScalarGridSpec(
            num_scalar_prefetch=0,
            grid=(num_tiles,),
            in_specs=[
                pl.BlockSpec((tile_b, n_obs_p), lambda i: (i, 0)),   # x batch tile
                pl.BlockSpec(memory_space=pl.ANY),                   # W1 (HBM, streamed)
                pl.BlockSpec((1, hidden_p), lambda i: (0, 0)),       # b1
                pl.BlockSpec(memory_space=pl.ANY),                   # W2 (HBM, streamed)
                pl.BlockSpec((1, hidden_p), lambda i: (0, 0)),       # b2
                pl.BlockSpec(memory_space=pl.ANY),                   # W3 (HBM, streamed)
                pl.BlockSpec((1, n_act_p), lambda i: (0, 0)),        # b3
            ],
            out_specs=pl.BlockSpec((tile_b, n_act_p), lambda i: (i, 0)),
            scratch_shapes=[
                pltpu.VMEM((2, chunk, hidden_p), jnp.bfloat16),      # W1 chunk double-buffer
                pltpu.VMEM((2, chunk, hidden_p), jnp.bfloat16),      # W2 chunk double-buffer
                pltpu.VMEM((hidden_p, n_act_p), jnp.bfloat16),       # W3 buffer
                pltpu.SemaphoreType.DMA((2,)),                       # W1 sems
                pltpu.SemaphoreType.DMA((2,)),                       # W2 sems
                pltpu.SemaphoreType.DMA((1,)),                       # W3 sem
            ],
        ),
        compiler_params=pltpu.CompilerParams(
            dimension_semantics=("parallel",),
            vmem_limit_bytes=vmem_limit,
        ),
        cost_estimate=cost,
    )(xp, w1p, b1p, w2p, b2p, w3p, b3p)

    return out_p[:B, :n_act]


def init_params(key, n_observations, hidden, n_actions):
    """Deterministic synthetic init (mimics nn.Linear uniform(-1/sqrt(fan_in), +))."""
    ks = jax.random.split(key, 6)

    def lin(kw, kb, fan_in, fan_out):
        bound = 1.0 / jnp.sqrt(jnp.float32(fan_in))
        w = jax.random.uniform(kw, (fan_in, fan_out), jnp.float32, -bound, bound)
        b = jax.random.uniform(kb, (1, fan_out), jnp.float32, -bound, bound)
        return w, b

    w1, b1 = lin(ks[0], ks[1], n_observations, hidden)
    w2, b2 = lin(ks[2], ks[3], hidden, hidden)
    w3, b3 = lin(ks[4], ks[5], hidden, n_actions)
    return {"w1": w1, "b1": b1, "w2": w2, "b2": b2, "w3": w3, "b3": b3}


@jax.jit
def dqn_reference(x, p):
    """Pure-JAX reference mirroring the kernel's bf16-weight / f32-accumulate numerics."""
    bf16, f32 = jnp.bfloat16, jnp.float32
    h = x.astype(bf16)
    h = jnp.maximum(jnp.dot(h, p["w1"].astype(bf16), preferred_element_type=f32) + p["b1"], 0.0)
    h = h.astype(bf16)
    h = jnp.maximum(jnp.dot(h, p["w2"].astype(bf16), preferred_element_type=f32) + p["b2"], 0.0)
    h = h.astype(bf16)
    return jnp.dot(h, p["w3"].astype(bf16), preferred_element_type=f32) + p["b3"]


if __name__ == "__main__":
    # Small shapes consistent with the module's forward (real module: n_obs=2601,
    # hidden=2500, n_act=4).  Ragged dims and a non-multiple-of-16 batch exercise
    # the padding, multi-chunk (n_obs) and single-chunk (hidden) streaming paths.
    B = 6
    N_OBS = 260
    HIDDEN = 250
    N_ACTIONS = 4

    key = jax.random.PRNGKey(0)
    k_x, k_p = jax.random.split(key)

    x = jax.random.normal(k_x, (B, N_OBS), dtype=jnp.float32)
    params = init_params(k_p, N_OBS, HIDDEN, N_ACTIONS)
    prepared, dims = prepare_params(params)

    out = dqn_forward(x, prepared, dims)
    out = jax.block_until_ready(out)

    ref = dqn_reference(x, params)
    assert out.shape == (B, N_ACTIONS)
    max_err = jnp.max(jnp.abs(out - ref))
    assert jnp.allclose(out, ref, atol=1e-2, rtol=1e-2), f"Pallas mismatch, max abs err={max_err}"

    print("KERNEL_OK")
</pallas_src>

<mosaic_0001>
module attributes {stable_mosaic.version = 11 : i64} {
  func.func @kernel(%arg0: i32, %arg1: memref<16x512xbf16, #tpu.memory_space<vmem>>, %arg2: memref<512x256xbf16, #tpu.memory_space<any>>, %arg3: memref<1x256xf32, #tpu.memory_space<vmem>>, %arg4: memref<256x256xbf16, #tpu.memory_space<any>>, %arg5: memref<1x256xf32, #tpu.memory_space<vmem>>, %arg6: memref<256x128xbf16, #tpu.memory_space<any>>, %arg7: memref<1x128xf32, #tpu.memory_space<vmem>>, %arg8: memref<16x128xf32, #tpu.memory_space<vmem>>, %arg9: memref<2x256x256xbf16, #tpu.memory_space<vmem>>, %arg10: memref<2x256x256xbf16, #tpu.memory_space<vmem>>, %arg11: memref<256x128xbf16, #tpu.memory_space<vmem>>, %arg12: memref<2x!tpu.dma_semaphore, #tpu.memory_space<semaphore_mem>>, %arg13: memref<2x!tpu.dma_semaphore, #tpu.memory_space<semaphore_mem>>, %arg14: memref<1x!tpu.dma_semaphore, #tpu.memory_space<semaphore_mem>>) attributes {dimension_semantics = [#tpu.dimension_semantics<parallel>], iteration_bounds = array<i64: 1>, scalar_prefetch = 0 : i64, scratch_operands = 6 : i64, tpu.core_type = #tpu.core_type<tc>, window_params = [{transform_indices = @transform_0, window_bounds = array<i64: 16, 512>}, {}, {pipeline_mode = #tpu.pipeline_mode<synchronous>, transform_indices = @transform_2, window_bounds = array<i64: 1, 256>}, {}, {pipeline_mode = #tpu.pipeline_mode<synchronous>, transform_indices = @transform_4, window_bounds = array<i64: 1, 256>}, {}, {pipeline_mode = #tpu.pipeline_mode<synchronous>, transform_indices = @transform_6, window_bounds = array<i64: 1, 128>}, {transform_indices = @transform_7, window_bounds = array<i64: 16, 128>}]} {
    %c0_i32 = arith.constant 0 : i32
    %c0_i32_0 = arith.constant 0 : i32
    %c0_i32_1 = arith.constant 0 : i32
    %c0_i32_2 = arith.constant 0 : i32
    %0 = tpu.memref_slice %arg2[%c0_i32_1, %c0_i32_2] : memref<512x256xbf16, #tpu.memory_space<any>> -> memref<256x256xbf16, #tpu.memory_space<any>>
    %c0_i32_3 = arith.constant 0 : i32
    %c0_i32_4 = arith.constant 0 : i32
    %1 = tpu.memref_slice %arg9[%c0_i32, %c0_i32_3, %c0_i32_4] : memref<2x256x256xbf16, #tpu.memory_space<vmem>> -> memref<1x256x256xbf16, #tpu.memory_space<vmem>>
    %2 = tpu.memref_squeeze %1 : memref<1x256x256xbf16, #tpu.memory_space<vmem>> -> memref<256x256xbf16, #tpu.memory_space<vmem>>
    %3 = tpu.memref_slice %arg12[%c0_i32_0] : memref<2x!tpu.dma_semaphore, #tpu.memory_space<semaphore_mem>> -> memref<1x!tpu.dma_semaphore, #tpu.memory_space<semaphore_mem>>
    %4 = tpu.memref_squeeze %3 : memref<1x!tpu.dma_semaphore, #tpu.memory_space<semaphore_mem>> -> memref<!tpu.dma_semaphore, #tpu.memory_space<semaphore_mem>>
    tpu.enqueue_dma source(%0 : memref<256x256xbf16, #tpu.memory_space<any>>) target(%2 : memref<256x256xbf16, #tpu.memory_space<vmem>>) target_semaphore(%4 : memref<!tpu.dma_semaphore, #tpu.memory_space<semaphore_mem>>)
    %c0_i32_5 = arith.constant 0 : i32
    %c0_i32_6 = arith.constant 0 : i32
    %c0_i32_7 = arith.constant 0 : i32
    %c0_i32_8 = arith.constant 0 : i32
    %5 = tpu.memref_slice %arg4[%c0_i32_7, %c0_i32_8] : memref<256x256xbf16, #tpu.memory_space<any>> -> memref<256x256xbf16, #tpu.memory_space<any>>
    %c0_i32_9 = arith.constant 0 : i32
    %c0_i32_10 = arith.constant 0 : i32
    %6 = tpu.memref_slice %arg10[%c0_i32_5, %c0_i32_9, %c0_i32_10] : memref<2x256x256xbf16, #tpu.memory_space<vmem>> -> memref<1x256x256xbf16, #tpu.memory_space<vmem>>
    %7 = tpu.memref_squeeze %6 : memref<1x256x256xbf16, #tpu.memory_space<vmem>> -> memref<256x256xbf16, #tpu.memory_space<vmem>>
    %8 = tpu.memref_slice %arg13[%c0_i32_6] : memref<2x!tpu.dma_semaphore, #tpu.memory_space<semaphore_mem>> -> memref<1x!tpu.dma_semaphore, #tpu.memory_space<semaphore_mem>>
    %9 = tpu.memref_squeeze %8 : memref<1x!tpu.dma_semaphore, #tpu.memory_space<semaphore_mem>> -> memref<!tpu.dma_semaphore, #tpu.memory_space<semaphore_mem>>
    tpu.enqueue_dma source(%5 : memref<256x256xbf16, #tpu.memory_space<any>>) target(%7 : memref<256x256xbf16, #tpu.memory_space<vmem>>) target_semaphore(%9 : memref<!tpu.dma_semaphore, #tpu.memory_space<semaphore_mem>>)
    %c0_i32_11 = arith.constant 0 : i32
    %10 = tpu.memref_slice %arg14[%c0_i32_11] : memref<1x!tpu.dma_semaphore, #tpu.memory_space<semaphore_mem>> -> memref<1x!tpu.dma_semaphore, #tpu.memory_space<semaphore_mem>>
    %11 = tpu.memref_squeeze %10 : memref<1x!tpu.dma_semaphore, #tpu.memory_space<semaphore_mem>> -> memref<!tpu.dma_semaphore, #tpu.memory_space<semaphore_mem>>
    tpu.enqueue_dma source(%arg6 : memref<256x128xbf16, #tpu.memory_space<any>>) target(%arg11 : memref<256x128xbf16, #tpu.memory_space<vmem>>) target_semaphore(%11 : memref<!tpu.dma_semaphore, #tpu.memory_space<semaphore_mem>>)
    %cst = arith.constant 0.000000e+00 : f32
    %12 = vector.broadcast %cst : f32 to vector<16x256xf32>
    %c0_i32_12 = arith.constant 0 : i32
    %c0_i32_13 = arith.constant 0 : i32
    %c0_i32_14 = arith.constant 0 : i32
    %c0_i32_15 = arith.constant 0 : i32
    %13 = tpu.memref_slice %arg2[%c0_i32_14, %c0_i32_15] : memref<512x256xbf16, #tpu.memory_space<any>> -> memref<256x256xbf16, #tpu.memory_space<any>>
    %c0_i32_16 = arith.constant 0 : i32
    %c0_i32_17 = arith.constant 0 : i32
    %14 = tpu.memref_slice %arg9[%c0_i32_12, %c0_i32_16, %c0_i32_17] : memref<2x256x256xbf16, #tpu.memory_space<vmem>> -> memref<1x256x256xbf16, #tpu.memory_space<vmem>>
    %15 = tpu.memref_squeeze %14 : memref<1x256x256xbf16, #tpu.memory_space<vmem>> -> memref<256x256xbf16, #tpu.memory_space<vmem>>
    %16 = tpu.memref_slice %arg12[%c0_i32_13] : memref<2x!tpu.dma_semaphore, #tpu.memory_space<semaphore_mem>> -> memref<1x!tpu.dma_semaphore, #tpu.memory_space<semaphore_mem>>
    %17 = tpu.memref_squeeze %16 : memref<1x!tpu.dma_semaphore, #tpu.memory_space<semaphore_mem>> -> memref<!tpu.dma_semaphore, #tpu.memory_space<semaphore_mem>>
    tpu.wait_dma2 semaphore(%17 : memref<!tpu.dma_semaphore, #tpu.memory_space<semaphore_mem>>) src(%13 : memref<256x256xbf16, #tpu.memory_space<any>>) dst(%15 : memref<256x256xbf16, #tpu.memory_space<vmem>>)
    %c1_i32 = arith.constant 1 : i32
    %c1_i32_18 = arith.constant 1 : i32
    %c256_i32 = arith.constant 256 : i32
    %c0_i32_19 = arith.constant 0 : i32
    %18 = tpu.memref_slice %arg2[%c256_i32, %c0_i32_19] : memref<512x256xbf16, #tpu.memory_space<any>> -> memref<256x256xbf16, #tpu.memory_space<any>>
    %c0_i32_20 = arith.constant 0 : i32
    %c0_i32_21 = arith.constant 0 : i32
    %19 = tpu.memref_slice %arg9[%c1_i32, %c0_i32_20, %c0_i32_21] : memref<2x256x256xbf16, #tpu.memory_space<vmem>> -> memref<1x256x256xbf16, #tpu.memory_space<vmem>>
    %20 = tpu.memref_squeeze %19 : memref<1x256x256xbf16, #tpu.memory_space<vmem>> -> memref<256x256xbf16, #tpu.memory_space<vmem>>
    %21 = tpu.memref_slice %arg12[%c1_i32_18] : memref<2x!tpu.dma_semaphore, #tpu.memory_space<semaphore_mem>> -> memref<1x!tpu.dma_semaphore, #tpu.memory_space<semaphore_mem>>
    %22 = tpu.memref_squeeze %21 : memref<1x!tpu.dma_semaphore, #tpu.memory_space<semaphore_mem>> -> memref<!tpu.dma_semaphore, #tpu.memory_space<semaphore_mem>>
    tpu.enqueue_dma source(%18 : memref<256x256xbf16, #tpu.memory_space<any>>) target(%20 : memref<256x256xbf16, #tpu.memory_space<vmem>>) target_semaphore(%22 : memref<!tpu.dma_semaphore, #tpu.memory_space<semaphore_mem>>)
    %c0 = arith.constant 0 : index
    %c0_22 = arith.constant 0 : index
    %23 = vector.load %arg1[%c0, %c0_22] : memref<16x512xbf16, #tpu.memory_space<vmem>>, vector<16x256xbf16>
    %c0_23 = arith.constant 0 : index
    %c0_24 = arith.constant 0 : index
    %c0_25 = arith.constant 0 : index
    %24 = vector.load %arg9[%c0_23, %c0_24, %c0_25] : memref<2x256x256xbf16, #tpu.memory_space<vmem>>, vector<1x256x256xbf16>
    %25 = vector.shape_cast %24 : vector<1x256x256xbf16> to vector<256x256xbf16>
    %cst_26 = arith.constant dense<0.000000e+00> : vector<16x256xf32>
    %26 = tpu.matmul %23, %25, %cst_26 {dimension_numbers = #tpu.dot_dimension_numbers<[1], [0], [0], [1], [0, 0, 1, 1], [], []>} : vector<16x256xbf16>, vector<256x256xbf16>, vector<16x256xf32> -> vector<16x256xf32>
    %27 = arith.addf %12, %26 : vector<16x256xf32>
    %c1_i32_27 = arith.constant 1 : i32
    %c1_i32_28 = arith.constant 1 : i32
    %c256_i32_29 = arith.constant 256 : i32
    %c0_i32_30 = arith.constant 0 : i32
    %28 = tpu.memref_slice %arg2[%c256_i32_29, %c0_i32_30] : memref<512x256xbf16, #tpu.memory_space<any>> -> memref<256x256xbf16, #tpu.memory_space<any>>
    %c0_i32_31 = arith.constant 0 : i32
    %c0_i32_32 = arith.constant 0 : i32
    %29 = tpu.memref_slice %arg9[%c1_i32_27, %c0_i32_31, %c0_i32_32] : memref<2x256x256xbf16, #tpu.memory_space<vmem>> -> memref<1x256x256xbf16, #tpu.memory_space<vmem>>
    %30 = tpu.memref_squeeze %29 : memref<1x256x256xbf16, #tpu.memory_space<vmem>> -> memref<256x256xbf16, #tpu.memory_space<vmem>>
    %31 = tpu.memref_slice %arg12[%c1_i32_28] : memref<2x!tpu.dma_semaphore, #tpu.memory_space<semaphore_mem>> -> memref<1x!tpu.dma_semaphore, #tpu.memory_space<semaphore_mem>>
    %32 = tpu.memref_squeeze %31 : memref<1x!tpu.dma_semaphore, #tpu.memory_space<semaphore_mem>> -> memref<!tpu.dma_semaphore, #tpu.memory_space<semaphore_mem>>
    tpu.wait_dma2 semaphore(%32 : memref<!tpu.dma_semaphore, #tpu.memory_space<semaphore_mem>>) src(%28 : memref<256x256xbf16, #tpu.memory_space<any>>) dst(%30 : memref<256x256xbf16, #tpu.memory_space<vmem>>)
    %c0_33 = arith.constant 0 : index
    %c256 = arith.constant 256 : index
    %33 = vector.load %arg1[%c0_33, %c256] : memref<16x512xbf16, #tpu.memory_space<vmem>>, vector<16x256xbf16>
    %c1 = arith.constant 1 : index
    %c0_34 = arith.constant 0 : index
    %c0_35 = arith.constant 0 : index
    %34 = vector.load %arg9[%c1, %c0_34, %c0_35] : memref<2x256x256xbf16, #tpu.memory_space<vmem>>, vector<1x256x256xbf16>
    %35 = vector.shape_cast %34 : vector<1x256x256xbf16> to vector<256x256xbf16>
    %cst_36 = arith.constant dense<0.000000e+00> : vector<16x256xf32>
    %36 = tpu.matmul %33, %35, %cst_36 {dimension_numbers = #tpu.dot_dimension_numbers<[1], [0], [0], [1], [0, 0, 1, 1], [], []>} : vector<16x256xbf16>, vector<256x256xbf16>, vector<16x256xf32> -> vector<16x256xf32>
    %37 = arith.addf %27, %36 : vector<16x256xf32>
    %c0_37 = arith.constant 0 : index
    %c0_38 = arith.constant 0 : index
    %38 = vector.load %arg3[%c0_37, %c0_38] : memref<1x256xf32, #tpu.memory_space<vmem>>, vector<1x256xf32>
    %39 = vector.broadcast %38 : vector<1x256xf32> to vector<16x256xf32>
    %40 = arith.addf %37, %39 : vector<16x256xf32>
    %cst_39 = arith.constant 0.000000e+00 : f32
    %41 = vector.broadcast %cst_39 : f32 to vector<16x256xf32>
    %42 = arith.maximumf %40, %41 : vector<16x256xf32>
    %43 = arith.truncf %42 : vector<16x256xf32> to vector<16x256xbf16>
    %cst_40 = arith.constant 0.000000e+00 : f32
    %44 = vector.broadcast %cst_40 : f32 to vector<16x256xf32>
    %c0_i32_41 = arith.constant 0 : i32
    %c0_i32_42 = arith.constant 0 : i32
    %c0_i32_43 = arith.constant 0 : i32
    %c0_i32_44 = arith.constant 0 : i32
    %45 = tpu.memref_slice %arg4[%c0_i32_43, %c0_i32_44] : memref<256x256xbf16, #tpu.memory_space<any>> -> memref<256x256xbf16, #tpu.memory_space<any>>
    %c0_i32_45 = arith.constant 0 : i32
    %c0_i32_46 = arith.constant 0 : i32
    %46 = tpu.memref_slice %arg10[%c0_i32_41, %c0_i32_45, %c0_i32_46] : memref<2x256x256xbf16, #tpu.memory_space<vmem>> -> memref<1x256x256xbf16, #tpu.memory_space<vmem>>
    %47 = tpu.memref_squeeze %46 : memref<1x256x256xbf16, #tpu.memory_space<vmem>> -> memref<256x256xbf16, #tpu.memory_space<vmem>>
    %48 = tpu.memref_slice %arg13[%c0_i32_42] : memref<2x!tpu.dma_semaphore, #tpu.memory_space<semaphore_mem>> -> memref<1x!tpu.dma_semaphore, #tpu.memory_space<semaphore_mem>>
    %49 = tpu.memref_squeeze %48 : memref<1x!tpu.dma_semaphore, #tpu.memory_space<semaphore_mem>> -> memref<!tpu.dma_semaphore, #tpu.memory_space<semaphore_mem>>
    tpu.wait_dma2 semaphore(%49 : memref<!tpu.dma_semaphore, #tpu.memory_space<semaphore_mem>>) src(%45 : memref<256x256xbf16, #tpu.memory_space<any>>) dst(%47 : memref<256x256xbf16, #tpu.memory_space<vmem>>)
    %c0_47 = arith.constant 0 : index
    %c0_48 = arith.constant 0 : index
    %c0_49 = arith.constant 0 : index
    %50 = vector.load %arg10[%c0_47, %c0_48, %c0_49] : memref<2x256x256xbf16, #tpu.memory_space<vmem>>, vector<1x256x256xbf16>
    %51 = vector.shape_cast %50 : vector<1x256x256xbf16> to vector<256x256xbf16>
    %cst_50 = arith.constant dense<0.000000e+00> : vector<16x256xf32>
    %52 = tpu.matmul %43, %51, %cst_50 {dimension_numbers = #tpu.dot_dimension_numbers<[1], [0], [0], [1], [0, 0, 1, 1], [], []>} : vector<16x256xbf16>, vector<256x256xbf16>, vector<16x256xf32> -> vector<16x256xf32>
    %53 = arith.addf %44, %52 : vector<16x256xf32>
    %c0_51 = arith.constant 0 : index
    %c0_52 = arith.constant 0 : index
    %54 = vector.load %arg5[%c0_51, %c0_52] : memref<1x256xf32, #tpu.memory_space<vmem>>, vector<1x256xf32>
    %55 = vector.broadcast %54 : vector<1x256xf32> to vector<16x256xf32>
    %56 = arith.addf %53, %55 : vector<16x256xf32>
    %cst_53 = arith.constant 0.000000e+00 : f32
    %57 = vector.broadcast %cst_53 : f32 to vector<16x256xf32>
    %58 = arith.maximumf %56, %57 : vector<16x256xf32>
    %59 = arith.truncf %58 : vector<16x256xf32> to vector<16x256xbf16>
    %c0_i32_54 = arith.constant 0 : i32
    %60 = tpu.memref_slice %arg14[%c0_i32_54] : memref<1x!tpu.dma_semaphore, #tpu.memory_space<semaphore_mem>> -> memref<1x!tpu.dma_semaphore, #tpu.memory_space<semaphore_mem>>
    %61 = tpu.memref_squeeze %60 : memref<1x!tpu.dma_semaphore, #tpu.memory_space<semaphore_mem>> -> memref<!tpu.dma_semaphore, #tpu.memory_space<semaphore_mem>>
    tpu.wait_dma2 semaphore(%61 : memref<!tpu.dma_semaphore, #tpu.memory_space<semaphore_mem>>) src(%arg6 : memref<256x128xbf16, #tpu.memory_space<any>>) dst(%arg11 : memref<256x128xbf16, #tpu.memory_space<vmem>>)
    %c0_55 = arith.constant 0 : index
    %c0_56 = arith.constant 0 : index
    %62 = vector.load %arg11[%c0_55, %c0_56] : memref<256x128xbf16, #tpu.memory_space<vmem>>, vector<256x128xbf16>
    %cst_57 = arith.constant dense<0.000000e+00> : vector<16x128xf32>
    %63 = tpu.matmul %59, %62, %cst_57 {dimension_numbers = #tpu.dot_dimension_numbers<[1], [0], [0], [1], [0, 0, 1, 1], [], []>} : vector<16x256xbf16>, vector<256x128xbf16>, vector<16x128xf32> -> vector<16x128xf32>
    %c0_58 = arith.constant 0 : index
    %c0_59 = arith.constant 0 : index
    %64 = vector.load %arg7[%c0_58, %c0_59] : memref<1x128xf32, #tpu.memory_space<vmem>>, vector<1x128xf32>
    %65 = vector.broadcast %64 : vector<1x128xf32> to vector<16x128xf32>
    %66 = arith.addf %63, %65 : vector<16x128xf32>
    %c0_60 = arith.constant 0 : index
    %c0_61 = arith.constant 0 : index
    %67 = vector.load %arg8[%c0_60, %c0_61] : memref<16x128xf32, #tpu.memory_space<vmem>>, vector<16x128xf32>
    tpu.vector_store %arg8[%c0_60, %c0_61], %66 {strides = array<i32>} : memref<16x128xf32, #tpu.memory_space<vmem>>, vector<16x128xf32>,
    return
  }
  func.func @transform_0(%arg0: i32) -> (i32, i32) {
    %c0_i32 = arith.constant 0 : i32
    %c0_i32_0 = arith.constant 0 : i32
    return %arg0, %c0_i32 : i32, i32
  }
  func.func @transform_2(%arg0: i32) -> (i32, i32) {
    %c0_i32 = arith.constant 0 : i32
    %c0_i32_0 = arith.constant 0 : i32
    %c0_i32_1 = arith.constant 0 : i32
    return %c0_i32, %c0_i32_0 : i32, i32
  }
  func.func @transform_4(%arg0: i32) -> (i32, i32) {
    %c0_i32 = arith.constant 0 : i32
    %c0_i32_0 = arith.constant 0 : i32
    %c0_i32_1 = arith.constant 0 : i32
    return %c0_i32, %c0_i32_0 : i32, i32
  }
  func.func @transform_6(%arg0: i32) -> (i32, i32) {
    %c0_i32 = arith.constant 0 : i32
    %c0_i32_0 = arith.constant 0 : i32
    %c0_i32_1 = arith.constant 0 : i32
    return %c0_i32, %c0_i32_0 : i32, i32
  }
  func.func @transform_7(%arg0: i32) -> (i32, i32) {
    %c0_i32 = arith.constant 0 : i32
    %c0_i32_0 = arith.constant 0 : i32
    return %arg0, %c0_i32 : i32, i32
  }
}

</mosaic_0001>

<bundles_post_ra>
// kernel: dqn_forward.1
= control target key start
LH: loop header
LB: loop body
LE: loop exit
PB: predicated region body
PF: predicated region fallthrough
CT: control target
= control target key end

     0   :  { %s1774_s27 = smov [#allocation2]   ;;  %s1775_s9 = smov [#allocation3]   ;;  %s2081_s0 = inlined_call_operand.vmem [shape: bf16[16,512], index: 0, kind: input, shape index: {}]   ;;  %s2082_s1 = inlined_call_operand.hbm [shape: bf16[512,256], index: 1, kind: input, shape index: {}]   ;;  %s2083_s2 = inlined_call_operand.vmem [shape: f32[1,256], index: 2, kind: input, shape index: {}]   ;;  %s2084_s4 = inlined_call_operand.vmem [shape: f32[1,256], index: 4, kind: input, shape index: {}]   ;;  %s2085_s6 = inlined_call_operand.vmem [shape: f32[1,128], index: 6, kind: input, shape index: {}]   ;;  %s2086_s7 = inlined_call_operand.vmem [shape: f32[16,128], index: 7, kind: output, shape index: {}]   ;;  %s2087_s3 = inlined_call_operand.hbm [shape: bf16[256,256], index: 3, kind: input, shape index: {}]   ;;  %s2088_s5 = inlined_call_operand.hbm [shape: bf16[256,128], index: 5, kind: input, shape index: {}]  }
   0x1   :  { %s27_s26 = sshll.u32 %s2082_s1, 4  ;;  %s29_s28 = sshll.u32 %s1774_s27, 4  ;;  %s28_s26 = int_to_ptr.hbm [resolvable:$true] %s27_s26  ;;  %s30_s28 = int_to_ptr.vmem [resolvable:$true] %s29_s28 }
   0x2   :  { %32 = dma.hbm_to_vmem [thread:$0]  %s28_s26, 4096, %s30_s28, [#allocation5] }
   0x3   :  { %s40_s8 = sshll.u32 %s2087_s3, 4  ;;  %s42_s10 = sshll.u32 %s1775_s9, 4  ;;  %s41_s8 = int_to_ptr.hbm [resolvable:$true] %s40_s8  ;;  %s43_s10 = int_to_ptr.vmem [resolvable:$true] %s42_s10 }
   0x4   :  { %45 = dma.hbm_to_vmem [thread:$0]  %s41_s8, 4096, %s43_s10, [#allocation6] }
   0x5   :  { %s53_s13 = sshll.u32 %s2088_s5, 4  ;;  %s1776_s14 = smov [#allocation4]   ;;  %s54_s13 = int_to_ptr.hbm [resolvable:$true] %s53_s13 }
   0x6   :  { %s55_s15 = sshll.u32 %s1776_s14, 4  ;;  %s56_s15 = int_to_ptr.vmem [resolvable:$true] %s55_s15 }
   0x7   :  { %58 = dma.hbm_to_vmem [thread:$0]  %s54_s13, 2048, %s56_s15, [#allocation7] }
   0x8   :  { %1766 = dma.done.wait [#allocation5], 4096 }
   0x9   :  { %1767 = vsyncadd [#allocation5], 4294963200  ;;  %s63_s3 = scalar_lea.hbm %s2082_s1, 256  ;;  %s1777_s19 = smov [#allocation2 + $0x100]   ;;  %v1833_v0 = vld [vmem:[%s2081_s0 + $0x4] sm:$0xf] }
   0xa   :  { %s73_s18 = sshll.u32 %s63_s3, 4  ;;  %s75_s20 = sshll.u32 %s1777_s19, 4  ;;  %2089 = vst [vmem:[#allocation22_spill] sm:$0xff] %v1833_v0  ;;  %v1838_v1 = vld [vmem:[%s2081_s0] sm:$0xf]  ;;  %s74_s18 = int_to_ptr.hbm [resolvable:$true] %s73_s18  ;;  %s76_s20 = int_to_ptr.vmem [resolvable:$true] %s75_s20 }
   0xb   :  { %78 = dma.hbm_to_vmem [thread:$0]  %s74_s18, 4096, %s76_s20, [#allocation5 + $0x1]  ;;  %2090 = vst [vmem:[#allocation23_spill] sm:$0xff] %v1838_v1  ;;  %v1843_v2 = vld [vmem:[%s2081_s0 + $0x10] sm:$0xf0] }
   0xc   :  { %2091 = vst [vmem:[#allocation24_spill] sm:$0xff] %v1843_v2  ;;  %v1848_v3 = vld [vmem:[%s2081_s0 + $0xc] sm:$0xf0]  ;;  %v1850_v4 = vld [vmem:[#allocation2 + $0x4] sm:$0xf] }
   0xd   :  { %2092 = vst [vmem:[#allocation25_spill] sm:$0xff] %v1848_v3  ;;  %v1852_v5 = vld [vmem:[#allocation2] sm:$0xf]  ;;  %v1854_v6 = vld [vmem:[#allocation2 + $0x8] sm:$0xf0] }
   0xe   :  { %2093 = vst [vmem:[#allocation26_spill] sm:$0xff] %v1850_v4  ;;  %v1856_v7 = vld [vmem:[#allocation2 + $0x4] sm:$0xf0]  ;;  %v1858_v8 = vld [vmem:[#allocation2 + $0x14] sm:$0xf] }
   0xf   :  { %2094 = vst [vmem:[#allocation27_spill] sm:$0xff] %v1852_v5  ;;  %v1860_v9 = vld [vmem:[#allocation2 + $0x10] sm:$0xf]  ;;  %v1862_v10 = vld [vmem:[#allocation2 + $0x18] sm:$0xf0] }
  0x10   :  { %2095 = vst [vmem:[#allocation28_spill] sm:$0xff] %v1854_v6  ;;  %v1864_v11 = vld [vmem:[#allocation2 + $0x14] sm:$0xf0]  ;;  %v1866_v12 = vld [vmem:[#allocation2 + $0x24] sm:$0xf] }
  0x11   :  { %2096 = vst [vmem:[#allocation29_spill] sm:$0xff] %v1856_v7  ;;  %v1868_v13 = vld [vmem:[#allocation2 + $0x20] sm:$0xf]  ;;  %v1870_v14 = vld [vmem:[#allocation2 + $0x28] sm:$0xf0] }
  0x12   :  { %2097 = vst [vmem:[#allocation30_spill] sm:$0xff] %v1858_v8  ;;  %v1872_v15 = vld [vmem:[#allocation2 + $0x24] sm:$0xf0]  ;;  %v1874_v16 = vld [vmem:[#allocation2 + $0x34] sm:$0xf] }
  0x13   :  { %2098 = vst [vmem:[#allocation31_spill] sm:$0xff] %v1860_v9  ;;  %v1876_v17 = vld [vmem:[#allocation2 + $0x30] sm:$0xf]  ;;  %v1878_v18 = vld [vmem:[#allocation2 + $0x38] sm:$0xf0] }
  0x14   :  { %2099 = vst [vmem:[#allocation32_spill] sm:$0xff] %v1862_v10  ;;  %v1880_v19 = vld [vmem:[#allocation2 + $0x34] sm:$0xf0]  ;;  %v1882_v20 = vld [vmem:[#allocation2 + $0x44] sm:$0xf] }
  0x15   :  { %2100 = vst [vmem:[#allocation33_spill] sm:$0xff] %v1864_v11  ;;  %v1884_v21 = vld [vmem:[#allocation2 + $0x40] sm:$0xf]  ;;  %v1886_v22 = vld [vmem:[#allocation2 + $0x48] sm:$0xf0] }
  0x16   :  { %2101 = vst [vmem:[#allocation34_spill] sm:$0xff] %v1866_v12  ;;  %v1888_v23 = vld [vmem:[#allocation2 + $0x44] sm:$0xf0]  ;;  %v1890_v24 = vld [vmem:[#allocation2 + $0x54] sm:$0xf] }
  0x17   :  { %2102 = vst [vmem:[#allocation35_spill] sm:$0xff] %v1868_v13  ;;  %v1892_v25 = vld [vmem:[#allocation2 + $0x50] sm:$0xf]  ;;  %v1894_v26 = vld [vmem:[#allocation2 + $0x58] sm:$0xf0] }
  0x18   :  { %2103 = vst [vmem:[#allocation36_spill] sm:$0xff] %v1870_v14  ;;  %v1896_v27 = vld [vmem:[#allocation2 + $0x54] sm:$0xf0]  ;;  %v1898_v28 = vld [vmem:[#allocation2 + $0x64] sm:$0xf] }
  0x19   :  { %2104 = vst [vmem:[#allocation37_spill] sm:$0xff] %v1872_v15  ;;  %v1900_v29 = vld [vmem:[#allocation2 + $0x60] sm:$0xf]  ;;  %v1902_v30 = vld [vmem:[#allocation2 + $0x68] sm:$0xf0] }
  0x1a   :  { %v1904_v31 = vld [vmem:[#allocation2 + $0x64] sm:$0xf0]  ;;  %v1906_v32 = vld [vmem:[#allocation2 + $0x74] sm:$0xf]  ;;  %v1908_v33 = vld [vmem:[#allocation2 + $0x70] sm:$0xf] }
  0x1b   :  { %v1910_v34 = vld [vmem:[#allocation2 + $0x78] sm:$0xf0]  ;;  %v1912_v35 = vld [vmem:[#allocation2 + $0x74] sm:$0xf0]  ;;  %v1914_v36 = vld [vmem:[#allocation2 + $0x84] sm:$0xf] }
  0x1c   :  { %2105 = vst [vmem:[#allocation38_spill] sm:$0xff] %v1914_v36  ;;  %v1916_v37 = vld [vmem:[#allocation2 + $0x80] sm:$0xf]  ;;  %v1918_v38 = vld [vmem:[#allocation2 + $0x88] sm:$0xf0] }
  0x1d   :  { %2106 = vst [vmem:[#allocation39_spill] sm:$0xff] %v1916_v37  ;;  %v1920_v39 = vld [vmem:[#allocation2 + $0x84] sm:$0xf0]  ;;  %v1922_v40 = vld [vmem:[#allocation2 + $0x94] sm:$0xf] }
  0x1e   :  { %2107 = vst [vmem:[#allocation40_spill] sm:$0xff] %v1918_v38  ;;  %v1924_v41 = vld [vmem:[#allocation2 + $0x90] sm:$0xf]  ;;  %v1926_v42 = vld [vmem:[#allocation2 + $0x98] sm:$0xf0] }
  0x1f   :  { %2108 = vst [vmem:[#allocation41_spill] sm:$0xff] %v1920_v39  ;;  %v1928_v43 = vld [vmem:[#allocation2 + $0x94] sm:$0xf0]  ;;  %v1930_v44 = vld [vmem:[#allocation2 + $0xa4] sm:$0xf] }
  0x20   :  { %2109 = vst [vmem:[#allocation42_spill] sm:$0xff] %v1922_v40  ;;  %v1932_v45 = vld [vmem:[#allocation2 + $0xa0] sm:$0xf]  ;;  %v1934_v46 = vld [vmem:[#allocation2 + $0xa8] sm:$0xf0] }
  0x21   :  { %2110 = vst [vmem:[#allocation43_spill] sm:$0xff] %v1924_v41  ;;  %v1936_v47 = vld [vmem:[#allocation2 + $0xa4] sm:$0xf0]  ;;  %v1938_v48 = vld [vmem:[#allocation2 + $0xb4] sm:$0xf] }
  0x22   :  { %2111 = vst [vmem:[#allocation44_spill] sm:$0xff] %v1926_v42  ;;  %v1940_v49 = vld [vmem:[#allocation2 + $0xb0] sm:$0xf]  ;;  %v1942_v50 = vld [vmem:[#allocation2 + $0xb8] sm:$0xf0] }
  0x23   :  { %2112 = vst [vmem:[#allocation45_spill] sm:$0xff] %v1928_v43  ;;  %v1944_v51 = vld [vmem:[#allocation2 + $0xb4] sm:$0xf0]  ;;  %v1946_v52 = vld [vmem:[#allocation2 + $0xc4] sm:$0xf] }
  0x24   :  { %2113 = vst [vmem:[#allocation46_spill] sm:$0xff] %v1930_v44  ;;  %v1948_v53 = vld [vmem:[#allocation2 + $0xc0] sm:$0xf]  ;;  %v1950_v54 = vld [vmem:[#allocation2 + $0xc8] sm:$0xf0] }
  0x25   :  { %2114 = vst [vmem:[#allocation47_spill] sm:$0xff] %v1932_v45  ;;  %v1952_v55 = vld [vmem:[#allocation2 + $0xc4] sm:$0xf0]  ;;  %v1954_v56 = vld [vmem:[#allocation2 + $0xd4] sm:$0xf] }
  0x26   :  { %2115 = vst [vmem:[#allocation48_spill] sm:$0xff] %v1934_v46  ;;  %v1956_v57 = vld [vmem:[#allocation2 + $0xd0] sm:$0xf]  ;;  %v1958_v58 = vld [vmem:[#allocation2 + $0xd8] sm:$0xf0] }
  0x27   :  { %2116 = vst [vmem:[#allocation49_spill] sm:$0xff] %v1936_v47  ;;  %v1960_v59 = vld [vmem:[#allocation2 + $0xd4] sm:$0xf0]  ;;  %v1962_v60 = vld [vmem:[#allocation2 + $0xe4] sm:$0xf] }
  0x28   :  { %2117 = vst [vmem:[#allocation50_spill] sm:$0xff] %v1938_v48  ;;  %v1964_v61 = vld [vmem:[#allocation2 + $0xe0] sm:$0xf]  ;;  %v1966_v62 = vld [vmem:[#allocation2 + $0xe8] sm:$0xf0] }
  0x29   :  { %v1968_v63 = vld [vmem:[#allocation2 + $0xe4] sm:$0xf0]  ;;  %v1970_v0 = vld [vmem:[#allocation2 + $0xf4] sm:$0xf]  ;;  %v1972_v2 = vld [vmem:[#allocation2 + $0xf0] sm:$0xf] }
  0x2a   :  { %v1974_v3 = vld [vmem:[#allocation2 + $0xf8] sm:$0xf0]  ;;  %v1976_v1 = vld [vmem:[#allocation2 + $0xf4] sm:$0xf0] }
  0x2b   :  { %1768 = dma.done.wait [#allocation5 + $0x1], 4096 }
  0x2c   :  { %1769 = vsyncadd [#allocation5 + $0x1], 4294963200  ;;  %v1146_v36 = vld [vmem:[#allocation2 + $0x170] sm:$0xf]  ;;  %v1600_v38 = vld [vmem:[#allocation2 + $0x174] sm:$0xf0] }
  0x2d   :  { %v1210_v4 = vld [vmem:[#allocation2 + $0x1f0] sm:$0xf]  ;;  %v1147_v6 = vor.u32 %v1600_v38, %v1146_v36  ;;  %v1616_v39 = vld [vmem:[#allocation2 + $0x1f4] sm:$0xf0]  ;;  %v1599_v37 = vld [vmem:[#allocation2 + $0x174] sm:$0xf] }
  0x2e   :  { %v1148_v7 = vld [vmem:[#allocation2 + $0x178] sm:$0xf0]  ;;  %v1211_v5 = vor.u32 %v1616_v39, %v1210_v4  ;;  %v1615_v42 = vld [vmem:[#allocation2 + $0x1f4] sm:$0xf]  ;;  %v1138_v10 = vld [vmem:[#allocation2 + $0x160] sm:$0xf] }
  0x2f   :  { %v1151_v40 = vor.u32 %v1599_v37, %v1148_v7  ;;  %v1212_v8 = vld [vmem:[#allocation2 + $0x1f8] sm:$0xf0]  ;;  %319 = vmatpush.bf16.msra.mxu0 %v1147_v6  ;;  %v1598_v41 = vld [vmem:[#allocation2 + $0x164] sm:$0xf0]  ;;  %v1202_v11 = vld [vmem:[#allocation2 + $0x1e0] sm:$0xf] }
  0x30   :  { %v1215_v43 = vor.u32 %v1615_v42, %v1212_v8  ;;  %v1614_v9 = vld [vmem:[#allocation2 + $0x1e4] sm:$0xf0]  ;;  %333 = vmatpush.bf16.msra.mxu1 %v1211_v5  ;;  %v1139_v44 = vor.u32 %v1598_v41, %v1138_v10  ;;  %v1597_v12 = vld [vmem:[#allocation2 + $0x164] sm:$0xf]  ;;  %v1140_v14 = vld [vmem:[#allocation2 + $0x168] sm:$0xf0] }
  0x31   :  { %347 = vmatpush.bf16.msra.mxu2 %v1151_v40  ;;  %v1203_v46 = vor.u32 %v1614_v9, %v1202_v11  ;;  %v1613_v36 = vld [vmem:[#allocation2 + $0x1e4] sm:$0xf]  ;;  %v1143_v38 = vor.u32 %v1597_v12, %v1140_v14  ;;  %v1204_v47 = vld [vmem:[#allocation2 + $0x1e8] sm:$0xf0]  ;;  %v1130_v4 = vld [vmem:[#allocation2 + $0x150] sm:$0xf] }
  0x32   :  { %361 = vmatpush.bf16.msra.mxu3 %v1215_v43  ;;  %v1596_v7 = vld [vmem:[#allocation2 + $0x154] sm:$0xf0]  ;;  %v1207_v37 = vor.u32 %v1613_v36, %v1204_v47  ;;  %v1194_v39 = vld [vmem:[#allocation2 + $0x1d0] sm:$0xf]  ;;  %v1595_v6 = vld [vmem:[#allocation2 + $0x154] sm:$0xf] }
  0x33   :  { %v1612_v45 = vld [vmem:[#allocation2 + $0x1d4] sm:$0xf0]  ;;  %320 = vmatpush.bf16.msra.mxu0 %v1139_v44  ;;  %v1131_v8 = vor.u32 %v1596_v7, %v1130_v4  ;;  %v1132_v42 = vld [vmem:[#allocation2 + $0x158] sm:$0xf0]  ;;  %v1611_v15 = vld [vmem:[#allocation2 + $0x1d4] sm:$0xf] }
  0x34   :  { %v1196_v5 = vld [vmem:[#allocation2 + $0x1d8] sm:$0xf0]  ;;  %334 = vmatpush.bf16.msra.mxu1 %v1203_v46  ;;  %v1195_v9 = vor.u32 %v1612_v45, %v1194_v39  ;;  %v1135_v10 = vor.u32 %v1595_v6, %v1132_v42  ;;  %v1122_v11 = vld [vmem:[#allocation2 + $0x140] sm:$0xf]  ;;  %v1594_v40 = vld [vmem:[#allocation2 + $0x144] sm:$0xf0] }
  0x35   :  { %348 = vmatpush.bf16.msra.mxu2 %v1143_v38  ;;  %v1186_v41 = vld [vmem:[#allocation2 + $0x1c0] sm:$0xf]  ;;  %v1199_v12 = vor.u32 %v1611_v15, %v1196_v5  ;;  %v1610_v14 = vld [vmem:[#allocation2 + $0x1c4] sm:$0xf0]  ;;  %v1593_v43 = vld [vmem:[#allocation2 + $0x144] sm:$0xf]  ;;  %v1123_v44 = vor.u32 %v1594_v40, %v1122_v11 }
  0x36   :  { %362 = vmatpush.bf16.msra.mxu3 %v1207_v37  ;;  %v1124_v47 = vld [vmem:[#allocation2 + $0x148] sm:$0xf0]  ;;  %v1609_v36 = vld [vmem:[#allocation2 + $0x1c4] sm:$0xf]  ;;  %v1187_v4 = vor.u32 %v1610_v14, %v1186_v41  ;;  %v1114_v46 = vld [vmem:[#allocation2 + $0x130] sm:$0xf] }
  0x37   :  { %v1188_v13 = vld [vmem:[#allocation2 + $0x1c8] sm:$0xf0]  ;;  %321 = vmatpush.bf16.msra.mxu0 %v1131_v8  ;;  %v1127_v7 = vor.u32 %v1593_v43, %v1124_v47  ;;  %v1592_v38 = vld [vmem:[#allocation2 + $0x134] sm:$0xf0]  ;;  %v1178_v45 = vld [vmem:[#allocation2 + $0x1b0] sm:$0xf] }
  0x38   :  { %335 = vmatpush.bf16.msra.mxu1 %v1195_v9  ;;  %v1191_v39 = vor.u32 %v1609_v36, %v1188_v13  ;;  %v1608_v6 = vld [vmem:[#allocation2 + $0x1b4] sm:$0xf0]  ;;  %v1591_v42 = vld [vmem:[#allocation2 + $0x134] sm:$0xf]  ;;  %v1116_v37 = vld [vmem:[#allocation2 + $0x138] sm:$0xf0]  ;;  %v1115_v48 = vor.u32 %v1592_v38, %v1114_v46 }
  0x39   :  { %349 = vmatpush.bf16.msra.mxu2 %v1135_v10  ;;  %v1607_v15 = vld [vmem:[#allocation2 + $0x1b4] sm:$0xf]  ;;  %v1180_v5 = vld [vmem:[#allocation2 + $0x1b8] sm:$0xf0]  ;;  %v1179_v8 = vor.u32 %v1608_v6, %v1178_v45  ;;  %v1119_v11 = vor.u32 %v1591_v42, %v1116_v37  ;;  %v1106_v9 = vld [vmem:[#allocation2 + $0x120] sm:$0xf] }
  0x3a   :  { %363 = vmatpush.bf16.msra.mxu3 %v1199_v12  ;;  %v1590_v10 = vld [vmem:[#allocation2 + $0x124] sm:$0xf0]  ;;  %v1170_v40 = vld [vmem:[#allocation2 + $0x1a0] sm:$0xf]  ;;  %v1183_v41 = vor.u32 %v1607_v15, %v1180_v5  ;;  %v1589_v43 = vld [vmem:[#allocation2 + $0x124] sm:$0xf] }
  0x3b   :  { %322 = vmatpush.bf16.msra.mxu0 %v1123_v44  ;;  %v1606_v14 = vld [vmem:[#allocation2 + $0x1a4] sm:$0xf0]  ;;  %v1108_v12 = vld [vmem:[#allocation2 + $0x128] sm:$0xf0]  ;;  %v1605_v13 = vld [vmem:[#allocation2 + $0x1a4] sm:$0xf]  ;;  %v1107_v36 = vor.u32 %v1590_v10, %v1106_v9 }
  0x3c   :  { %336 = vmatpush.bf16.msra.mxu1 %v1187_v4  ;;  %v1172_v47 = vld [vmem:[#allocation2 + $0x1a8] sm:$0xf0]  ;;  %v1171_v44 = vor.u32 %v1606_v14, %v1170_v40  ;;  %v1111_v46 = vor.u32 %v1589_v43, %v1108_v12  ;;  %v1098_v4 = vld [vmem:[#allocation2 + $0x110] sm:$0xf]  ;;  %v1604_v6 = vld [vmem:[#allocation2 + $0x194] sm:$0xf0] }
  0x3d   :  { %350 = vmatpush.bf16.msra.mxu2 %v1127_v7  ;;  %v1588_v7 = vld [vmem:[#allocation2 + $0x114] sm:$0xf0]  ;;  %v1162_v38 = vld [vmem:[#allocation2 + $0x190] sm:$0xf]  ;;  %v1175_v45 = vor.u32 %v1605_v13, %v1172_v47  ;;  %v1587_v42 = vld [vmem:[#allocation2 + $0x114] sm:$0xf] }
  0x3e   :  { %364 = vmatpush.bf16.msra.mxu3 %v1191_v39  ;;  %v1100_v39 = vld [vmem:[#allocation2 + $0x118] sm:$0xf0]  ;;  %v1603_v37 = vld [vmem:[#allocation2 + $0x194] sm:$0xf]  ;;  %v1099_v5 = vor.u32 %v1588_v7, %v1098_v4  ;;  %v1154_v10 = vld [vmem:[#allocation2 + $0x180] sm:$0xf] }
  0x3f   :  { %323 = vmatpush.bf16.msra.mxu0 %v1115_v48  ;;  %v1164_v15 = vld [vmem:[#allocation2 + $0x198] sm:$0xf0]  ;;  %v1163_v48 = vor.u32 %v1604_v6, %v1162_v38  ;;  %v1103_v9 = vor.u32 %v1587_v42, %v1100_v39  ;;  %v1602_v14 = vld [vmem:[#allocation2 + $0x184] sm:$0xf0]  ;;  %v1585_v43 = vld [vmem:[#allocation2 + $0x104] sm:$0xf]  ;;  %v1283_v38 = vor.u32 %v1912_v35, %v1908_v33  ;;  %v1347_v42 = vor.u32 %v1976_v1, %v1972_v2 }
  0x40   :  { %337 = vmatpush.bf16.msra.mxu1 %v1179_v8  ;;  %v1090_v8 = vld [vmem:[#allocation2 + $0x100] sm:$0xf]  ;;  %v1167_v40 = vor.u32 %v1603_v37, %v1164_v15  ;;  %v1601_v12 = vld [vmem:[#allocation2 + $0x184] sm:$0xf]  ;;  %v1156_v13 = vld [vmem:[#allocation2 + $0x188] sm:$0xf0]  ;;  %v1287_v39 = vor.u32 %v1906_v32, %v1910_v34  ;;  %v1351_v37 = vor.u32 %v1970_v0, %v1974_v3  ;;  %v1275_v35 = vor.u32 %v1904_v31, %v1900_v29 }
  0x41   :  { %351 = vmatpush.bf16.msra.mxu2 %v1119_v11  ;;  %v1586_v11 = vld [vmem:[#allocation2 + $0x104] sm:$0xf0]  ;;  %v1159_v7 = vor.u32 %v1601_v12, %v1156_v13  ;;  %v1084_v6 = vld [vmem:[%s2081_s0 + $0x18] sm:$0xf0]  ;;  %v1339_v1 = vor.u32 %v1968_v63, %v1964_v61  ;;  %v1279_v2 = vor.u32 %v1898_v28, %v1902_v30  ;;  %v1343_v0 = vor.u32 %v1962_v60, %v1966_v62  ;;  %v2118_v32 = vld [vmem:[#allocation50_spill] sm:$0xff] }
  0x42   :  { %365 = vmatpush.bf16.msra.mxu3 %v1183_v41  ;;  %v1092_v41 = vld [vmem:[#allocation2 + $0x108] sm:$0xf0]  ;;  %v1091_v47 = vor.u32 %v1586_v11, %v1090_v8  ;;  %v1267_v3 = vor.u32 %v1896_v27, %v1892_v25  ;;  %v1331_v29 = vor.u32 %v1960_v59, %v1956_v57  ;;  %v1271_v28 = vor.u32 %v1890_v24, %v1894_v26  ;;  %v2120_v34 = vld [vmem:[#allocation37_spill] sm:$0xff]  ;;  %v2131_v61 = vld [vmem:[#allocation32_spill] sm:$0xff] }
  0x43   :  { %324 = vmatpush.bf16.msra.mxu0 %v1107_v36  ;;  %v1155_v36 = vor.u32 %v1602_v14, %v1154_v10  ;;  %v1095_v4 = vor.u32 %v1585_v43, %v1092_v41  ;;  %v1335_v30 = vor.u32 %v1954_v56, %v1958_v58  ;;  %v1259_v31 = vor.u32 %v1888_v23, %v1884_v21  ;;  %v2128_v57 = vld [vmem:[#allocation33_spill] sm:$0xff]  ;;  %v2129_v58 = vld [vmem:[#allocation43_spill] sm:$0xff]  ;;  %v2132_v62 = vld [vmem:[#allocation30_spill] sm:$0xff] }
  0x44   :  { %338 = vmatpush.bf16.msra.mxu1 %v1171_v44  ;;  %v1082_v44 = vld [vmem:[%s2081_s0 + $0x8] sm:$0xf]  ;;  %v1323_v25 = vor.u32 %v1952_v55, %v1948_v53  ;;  %v1263_v27 = vor.u32 %v1882_v20, %v1886_v22  ;;  %v1327_v24 = vor.u32 %v1946_v52, %v1950_v54  ;;  %v1251_v26 = vor.u32 %v1880_v19, %v1876_v17  ;;  %v2122_v17 = vld [vmem:[#allocation49_spill] sm:$0xff]  ;;  %v2123_v54 = vld [vmem:[#allocation36_spill] sm:$0xff] }
  0x45   :  { %352 = vmatpush.bf16.msra.mxu2 %v1111_v46  ;;  %v1584_v46 = vld [vmem:[%s2081_s0 + $0x14] sm:$0xf0]  ;;  %v1315_v21 = vor.u32 %v1944_v51, %v1940_v49  ;;  %v1255_v23 = vor.u32 %v1874_v16, %v1878_v18  ;;  %v1319_v20 = vor.u32 %v2118_v32, %v1942_v50  ;;  %v2119_v22 = vld [vmem:[#allocation35_spill] sm:$0xff]  ;;  %v2124_v55 = vld [vmem:[#allocation34_spill] sm:$0xff]  ;;  %v1239_v63 = vor.u32 %v2132_v62, %v2131_v61 }
  0x46   :  { %366 = vmatpush.bf16.msra.mxu3 %v1175_v45  ;;  %v1583_v45 = vld [vmem:[%s2081_s0 + $0xc] sm:$0xf]  ;;  %v1083_v15 = vor.u32 %v1584_v46, %v1082_v44  ;;  %v1243_v52 = vor.u32 %v2120_v34, %v2119_v22  ;;  %v1247_v56 = vor.u32 %v2124_v55, %v2123_v54  ;;  %v2125_v49 = vld [vmem:[#allocation48_spill] sm:$0xff]  ;;  %v2126_v51 = vld [vmem:[#allocation46_spill] sm:$0xff] }
  0x47   :  { %325 = vmatpush.bf16.msra.mxu0 %v1099_v5  ;;  %v1087_v33 = vor.u32 %v1583_v45, %v1084_v6  ;;  %v2121_v53 = vld [vmem:[#allocation47_spill] sm:$0xff]  ;;  %v1311_v16 = vor.u32 %v2126_v51, %v2125_v49  ;;  %v2130_v59 = vld [vmem:[#allocation45_spill] sm:$0xff]  ;;  %v2133_v5 = vld [vmem:[#allocation44_spill] sm:$0xff] }
  0x48   :  { %339 = vmatpush.bf16.msra.mxu1 %v1163_v48  ;;  %v1307_v19 = vor.u32 %v2122_v17, %v2121_v53  ;;  %v2127_v18 = vld [vmem:[#allocation31_spill] sm:$0xff]  ;;  %v1299_v60 = vor.u32 %v2130_v59, %v2129_v58  ;;  %v2134_v48 = vld [vmem:[#allocation42_spill] sm:$0xff]  ;;  %v2136_v11 = vld [vmem:[#allocation29_spill] sm:$0xff] }
  0x49   :  { %353 = vmatpush.bf16.msra.mxu2 %v1103_v9  ;;  %v1235_v50 = vor.u32 %v2128_v57, %v2127_v18  ;;  %v1303_v9 = vor.u32 %v2134_v48, %v2133_v5  ;;  %v2135_v8 = vld [vmem:[#allocation27_spill] sm:$0xff]  ;;  %v2138_v14 = vld [vmem:[#allocation41_spill] sm:$0xff]  ;;  %v2139_v41 = vld [vmem:[#allocation28_spill] sm:$0xff] }
  0x4a   :  { %367 = vmatpush.bf16.msra.mxu3 %v1167_v40  ;;  %v1227_v10 = vor.u32 %v2136_v11, %v2135_v8  ;;  %v2137_v40 = vld [vmem:[#allocation39_spill] sm:$0xff]  ;;  %v2140_v12 = vld [vmem:[#allocation26_spill] sm:$0xff]  ;;  %v2144_v46 = vld [vmem:[#allocation25_spill] sm:$0xff] }
  0x4b   :  { %326 = vmatpush.bf16.msra.mxu0 %v1091_v47  ;;  %v1291_v43 = vor.u32 %v2138_v14, %v2137_v40  ;;  %v1231_v13 = vor.u32 %v2140_v12, %v2139_v41  ;;  %v2141_v47 = vld [vmem:[#allocation40_spill] sm:$0xff]  ;;  %v2143_v44 = vld [vmem:[#allocation23_spill] sm:$0xff]  ;;  %v2146_v45 = vld [vmem:[#allocation22_spill] sm:$0xff] }
  0x4c   :  { %340 = vmatpush.bf16.msra.mxu1 %v1155_v36  ;;  %v2142_v36 = vld [vmem:[#allocation38_spill] sm:$0xff] }
  0x4d   :  { %354 = vmatpush.bf16.msra.mxu2 %v1095_v4  ;;  %v1295_v4 = vor.u32 %v2142_v36, %v2141_v47 }
  0x4e   :  { %368 = vmatpush.bf16.msra.mxu3 %v1159_v7  ;;  %327 = vmatmul.bf16.vlgmr.msra.gmra.mxu0 %v1083_v15  ;;  %v1219_v7 = vor.u32 %v2144_v46, %v2143_v44 }
  0x4f   :  { %545 = vmatpush.bf16.msrb.mxu0 %v1283_v38  ;;  %341 = vmatmul.bf16.vlgmr.msra.gmra.mxu1 %v1087_v33  ;;  %v2145_v38 = vld [vmem:[#allocation24_spill] sm:$0xff] }
  0x50   :  { %559 = vmatpush.bf16.msrb.mxu1 %v1347_v42  ;;  %355 = vmatmul.bf16.vlgmr.msra.gmra.mxu2 %v1083_v15  ;;  %v1223_v6 = vor.u32 %v2146_v45, %v2145_v38 }
  0x51   :  { %573 = vmatpush.bf16.msrb.mxu2 %v1287_v39  ;;  %369 = vmatmul.bf16.vlgmr.msra.gmra.mxu3 %v1087_v33 }
  0x52   :  { %587 = vmatpush.bf16.msrb.mxu3 %v1351_v37 }
  0x53   :  { %546 = vmatpush.bf16.msrb.mxu0 %v1275_v35 }
  0x54   :  { %560 = vmatpush.bf16.msrb.mxu1 %v1339_v1 }
  0x55   :  { %574 = vmatpush.bf16.msrb.mxu2 %v1279_v2 }
  0x56   :  { %588 = vmatpush.bf16.msrb.mxu3 %v1343_v0 }
  0x57   :  { %547 = vmatpush.bf16.msrb.mxu0 %v1267_v3 }
  0x58   :  { %561 = vmatpush.bf16.msrb.mxu1 %v1331_v29 }
  0x59   :  { %575 = vmatpush.bf16.msrb.mxu2 %v1271_v28 }
  0x5a   :  { %589 = vmatpush.bf16.msrb.mxu3 %v1335_v30  ;;  %v601_v30 = vld [vmem:[%s2083_s2] sm:$0x3] }
  0x5b   :  { %548 = vmatpush.bf16.msrb.mxu0 %v1259_v31  ;;  %v604_v54 = vperm.slane %v601_v30, 1 }
  0x5c   :  { %562 = vmatpush.bf16.msrb.mxu1 %v1323_v25 }
  0x5d   :  { %576 = vmatpush.bf16.msrb.mxu2 %v1263_v27  ;;  %v603_v27 = vperm.slane %v601_v30, 0 }
  0x5e   :  { %590 = vmatpush.bf16.msrb.mxu3 %v1327_v24 }
  0x5f   :  { %549 = vmatpush.bf16.msrb.mxu0 %v1251_v26 }
  0x60   :  { %563 = vmatpush.bf16.msrb.mxu1 %v1315_v21 }
  0x61   :  { %577 = vmatpush.bf16.msrb.mxu2 %v1255_v23 }
  0x62   :  { %591 = vmatpush.bf16.msrb.mxu3 %v1319_v20 }
  0x63   :  { %550 = vmatpush.bf16.msrb.mxu0 %v1243_v52 }
  0x64   :  { %564 = vmatpush.bf16.msrb.mxu1 %v1307_v19 }
  0x65   :  { %578 = vmatpush.bf16.msrb.mxu2 %v1247_v56 }
  0x66   :  { %592 = vmatpush.bf16.msrb.mxu3 %v1311_v16 }
  0x67   :  { %551 = vmatpush.bf16.msrb.mxu0 %v1235_v50 }
  0x68   :  { %565 = vmatpush.bf16.msrb.mxu1 %v1299_v60 }
  0x69   :  { %579 = vmatpush.bf16.msrb.mxu2 %v1239_v63 }
  0x6a   :  { %593 = vmatpush.bf16.msrb.mxu3 %v1303_v9 }
  0x6b   :  { %552 = vmatpush.bf16.msrb.mxu0 %v1227_v10 }
  0x6c   :  { %566 = vmatpush.bf16.msrb.mxu1 %v1291_v43 }
  0x6d   :  { %580 = vmatpush.bf16.msrb.mxu2 %v1231_v13 }
  0x6e   :  { %594 = vmatpush.bf16.msrb.mxu3 %v1295_v4  ;;  %553 = vmatmul.bf16.vlgmr.msrb.gmra.mxu0 %v1219_v7 }
  0x6f   :  { %567 = vmatmul.bf16.vlgmr.msrb.gmra.mxu1 %v1223_v6 }
  0x70   :  { %581 = vmatmul.bf16.vlgmr.msrb.gmra.mxu2 %v1219_v7 }
  0x71   :  { %595 = vmatmul.bf16.vlgmr.msrb.gmra.mxu3 %v1223_v6 }
  0xcb   :  { %v328_v42 = vpop.f32.mrf.mxu0 }
  0xcc   :  { %v342_v39 = vpop.f32.mrf.mxu1 }
  0xcd   :  { %v343_v3 = vadd.f32 %v342_v39, %v328_v42 }
  0xd3   :  { %v356_v37 = vpop.f32.mrf.mxu2  ;;  %v330_v33 = vpop.f32.mrf.mxu0 }
  0xd4   :  { %v370_v15 = vpop.f32.mrf.mxu3  ;;  %v344_v35 = vpop.f32.mrf.mxu1 }
  0xd5   :  { %v345_v31 = vadd.f32 %v344_v35, %v330_v33  ;;  %v371_v26 = vadd.f32 %v370_v15, %v356_v37 }
  0xdb   :  { %v358_v1 = vpop.f32.mrf.mxu2 }
  0xdc   :  { %v372_v2 = vpop.f32.mrf.mxu3 }
  0xdd   :  { %v373_v17 = vadd.f32 %v372_v2, %v358_v1 }
  0xeb   :  { %v554_v0 = vpop.f32.mrf.mxu0 }
  0xec   :  { %v568_v29 = vpop.f32.mrf.mxu1  ;;  %v555_v28 = vadd.f32 %v554_v0, %v343_v3 }
  0xee   :  { %v569_v25 = vadd.f32 %v568_v29, %v555_v28 }
  0xf0   :  { %v607_v34 = vadd.f32 %v603_v27, %v569_v25 }
  0xf2   :  { %v611_v55 = vmax.f32 %v607_v34, 0.0 }
  0xf3   :  { %v582_v24 = vpop.f32.mrf.mxu2  ;;  %v556_v23 = vpop.f32.mrf.mxu0 }
  0xf4   :  { %v596_v21 = vpop.f32.mrf.mxu3  ;;  %v557_v32 = vadd.f32 %v556_v23, %v345_v31  ;;  %v583_v20 = vadd.f32 %v582_v24, %v371_v26  ;;  %v570_v22 = vpop.f32.mrf.mxu1 }
  0xf6   :  { %v571_v52 = vadd.f32 %v570_v22, %v557_v32  ;;  %v597_v19 = vadd.f32 %v596_v21, %v583_v20 }
  0xf8   :  { %v609_v53 = vadd.f32 %v603_v27, %v571_v52  ;;  %v608_v57 = vadd.f32 %v604_v54, %v597_v19 }
  0xfa   :  { %v613_v56 = vmax.f32 %v609_v53, 0.0  ;;  %v612_v59 = vmax.f32 %v608_v57, 0.0 }
  0xfb   :  { %v584_v49 = vpop.f32.mrf.mxu2 }
  0xfc   :  { %v585_v51 = vadd.f32 %v584_v49, %v373_v17  ;;  %v2061_v16 = vpack.c.bf16 %v613_v56, %v611_v55  ;;  %v598_v18 = vpop.f32.mrf.mxu3 }
  0xfe   :  { %v599_v50 = vadd.f32 %v598_v18, %v585_v51 }
 0x100   :  { %v610_v58 = vadd.f32 %v604_v54, %v599_v50 }
 0x102   :  { %v614_v60 = vmax.f32 %v610_v58, 0.0 }
 0x104   :  { %v2063_v61 = vpack.c.bf16 %v614_v60, %v612_v59 }
 0x105   :  { %1770 = dma.done.wait [#allocation6], 4096 }
 0x106   :  { %1771 = vsyncadd [#allocation6], 4294963200  ;;  %v1410_v62 = vld [vmem:[#allocation3 + $0x70] sm:$0xf]  ;;  %v1632_v63 = vld [vmem:[#allocation3 + $0x74] sm:$0xf0] }
 0x107   :  { %v1474_v5 = vld [vmem:[#allocation3 + $0xf0] sm:$0xf]  ;;  %v1411_v48 = vor.u32 %v1632_v63, %v1410_v62  ;;  %v1648_v9 = vld [vmem:[#allocation3 + $0xf4] sm:$0xf0]  ;;  %v1631_v8 = vld [vmem:[#allocation3 + $0x74] sm:$0xf] }
 0x108   :  { %v1412_v11 = vld [vmem:[#allocation3 + $0x78] sm:$0xf0]  ;;  %v1475_v10 = vor.u32 %v1648_v9, %v1474_v5  ;;  %v1647_v14 = vld [vmem:[#allocation3 + $0xf4] sm:$0xf]  ;;  %v1402_v41 = vld [vmem:[#allocation3 + $0x60] sm:$0xf] }
 0x109   :  { %v1415_v40 = vor.u32 %v1631_v8, %v1412_v11  ;;  %v1476_v43 = vld [vmem:[#allocation3 + $0xf8] sm:$0xf0]  ;;  %817 = vmatpush.bf16.msra.mxu0 %v1411_v48  ;;  %v1630_v13 = vld [vmem:[#allocation3 + $0x64] sm:$0xf0]  ;;  %v1466_v47 = vld [vmem:[#allocation3 + $0xe0] sm:$0xf] }
 0x10a   :  { %v1479_v12 = vor.u32 %v1647_v14, %v1476_v43  ;;  %v1646_v36 = vld [vmem:[#allocation3 + $0xe4] sm:$0xf0]  ;;  %831 = vmatpush.bf16.msra.mxu1 %v1475_v10  ;;  %v1403_v4 = vor.u32 %v1630_v13, %v1402_v41  ;;  %v1629_v46 = vld [vmem:[#allocation3 + $0x64] sm:$0xf]  ;;  %v1404_v7 = vld [vmem:[#allocation3 + $0x68] sm:$0xf0] }
 0x10b   :  { %845 = vmatpush.bf16.msra.mxu2 %v1415_v40  ;;  %v1467_v44 = vor.u32 %v1646_v36, %v1466_v47  ;;  %v1645_v38 = vld [vmem:[#allocation3 + $0xe4] sm:$0xf]  ;;  %v1407_v45 = vor.u32 %v1629_v46, %v1404_v7  ;;  %v1468_v6 = vld [vmem:[#allocation3 + $0xe8] sm:$0xf0]  ;;  %v1394_v42 = vld [vmem:[#allocation3 + $0x50] sm:$0xf] }
 0x10c   :  { %859 = vmatpush.bf16.msra.mxu3 %v1479_v12  ;;  %v1628_v39 = vld [vmem:[#allocation3 + $0x54] sm:$0xf0]  ;;  %v1471_v37 = vor.u32 %v1645_v38, %v1468_v6  ;;  %v1458_v15 = vld [vmem:[#allocation3 + $0xd0] sm:$0xf]  ;;  %v1627_v35 = vld [vmem:[#allocation3 + $0x54] sm:$0xf] }
 0x10d   :  { %v1644_v33 = vld [vmem:[#allocation3 + $0xd4] sm:$0xf0]  ;;  %818 = vmatpush.bf16.msra.mxu0 %v1403_v4  ;;  %v1395_v1 = vor.u32 %v1628_v39, %v1394_v42  ;;  %v1396_v2 = vld [vmem:[#allocation3 + $0x58] sm:$0xf0]  ;;  %v1643_v0 = vld [vmem:[#allocation3 + $0xd4] sm:$0xf] }
 0x10e   :  { %v1460_v3 = vld [vmem:[#allocation3 + $0xd8] sm:$0xf0]  ;;  %832 = vmatpush.bf16.msra.mxu1 %v1467_v44  ;;  %v1459_v29 = vor.u32 %v1644_v33, %v1458_v15  ;;  %v1399_v28 = vor.u32 %v1627_v35, %v1396_v2  ;;  %v1386_v30 = vld [vmem:[#allocation3 + $0x40] sm:$0xf]  ;;  %v1626_v31 = vld [vmem:[#allocation3 + $0x44] sm:$0xf0] }
 0x10f   :  { %846 = vmatpush.bf16.msra.mxu2 %v1407_v45  ;;  %v1450_v25 = vld [vmem:[#allocation3 + $0xc0] sm:$0xf]  ;;  %v1463_v27 = vor.u32 %v1643_v0, %v1460_v3  ;;  %v1642_v24 = vld [vmem:[#allocation3 + $0xc4] sm:$0xf0]  ;;  %v1625_v26 = vld [vmem:[#allocation3 + $0x44] sm:$0xf]  ;;  %v1387_v20 = vor.u32 %v1626_v31, %v1386_v30 }
 0x110   :  { %860 = vmatpush.bf16.msra.mxu3 %v1471_v37  ;;  %v1388_v21 = vld [vmem:[#allocation3 + $0x48] sm:$0xf0]  ;;  %v1641_v23 = vld [vmem:[#allocation3 + $0xc4] sm:$0xf]  ;;  %v1451_v22 = vor.u32 %v1642_v24, %v1450_v25  ;;  %v1378_v52 = vld [vmem:[#allocation3 + $0x30] sm:$0xf] }
 0x111   :  { %v1452_v32 = vld [vmem:[#allocation3 + $0xc8] sm:$0xf0]  ;;  %819 = vmatpush.bf16.msra.mxu0 %v1395_v1  ;;  %v1391_v34 = vor.u32 %v1625_v26, %v1388_v21  ;;  %v1624_v53 = vld [vmem:[#allocation3 + $0x34] sm:$0xf0]  ;;  %v1442_v17 = vld [vmem:[#allocation3 + $0xb0] sm:$0xf] }
 0x112   :  { %833 = vmatpush.bf16.msra.mxu1 %v1459_v29  ;;  %v1455_v19 = vor.u32 %v1641_v23, %v1452_v32  ;;  %v1640_v54 = vld [vmem:[#allocation3 + $0xb4] sm:$0xf0]  ;;  %v1623_v55 = vld [vmem:[#allocation3 + $0x34] sm:$0xf]  ;;  %v1380_v56 = vld [vmem:[#allocation3 + $0x38] sm:$0xf0]  ;;  %v1379_v18 = vor.u32 %v1624_v53, %v1378_v52 }
 0x113   :  { %847 = vmatpush.bf16.msra.mxu2 %v1399_v28  ;;  %v1639_v49 = vld [vmem:[#allocation3 + $0xb4] sm:$0xf]  ;;  %v1444_v51 = vld [vmem:[#allocation3 + $0xb8] sm:$0xf0]  ;;  %v1443_v57 = vor.u32 %v1640_v54, %v1442_v17  ;;  %v1383_v50 = vor.u32 %v1623_v55, %v1380_v56  ;;  %v1370_v58 = vld [vmem:[#allocation3 + $0x20] sm:$0xf] }
 0x114   :  { %861 = vmatpush.bf16.msra.mxu3 %v1463_v27  ;;  %v1622_v59 = vld [vmem:[#allocation3 + $0x24] sm:$0xf0]  ;;  %v1434_v60 = vld [vmem:[#allocation3 + $0xa0] sm:$0xf]  ;;  %v1447_v62 = vor.u32 %v1639_v49, %v1444_v51  ;;  %v1621_v5 = vld [vmem:[#allocation3 + $0x24] sm:$0xf] }
 0x115   :  { %820 = vmatpush.bf16.msra.mxu0 %v1387_v20  ;;  %v1638_v63 = vld [vmem:[#allocation3 + $0xa4] sm:$0xf0]  ;;  %v1372_v48 = vld [vmem:[#allocation3 + $0x28] sm:$0xf0]  ;;  %v1637_v9 = vld [vmem:[#allocation3 + $0xa4] sm:$0xf]  ;;  %v1371_v11 = vor.u32 %v1622_v59, %v1370_v58 }
 0x116   :  { %834 = vmatpush.bf16.msra.mxu1 %v1451_v22  ;;  %v1436_v8 = vld [vmem:[#allocation3 + $0xa8] sm:$0xf0]  ;;  %v1435_v10 = vor.u32 %v1638_v63, %v1434_v60  ;;  %v1375_v40 = vor.u32 %v1621_v5, %v1372_v48  ;;  %v1362_v14 = vld [vmem:[#allocation3 + $0x10] sm:$0xf]  ;;  %v1620_v43 = vld [vmem:[#allocation3 + $0x14] sm:$0xf0] }
 0x117   :  { %848 = vmatpush.bf16.msra.mxu2 %v1391_v34  ;;  %v1426_v41 = vld [vmem:[#allocation3 + $0x90] sm:$0xf]  ;;  %v1439_v12 = vor.u32 %v1637_v9, %v1436_v8  ;;  %v1636_v13 = vld [vmem:[#allocation3 + $0x94] sm:$0xf0]  ;;  %v1619_v47 = vld [vmem:[#allocation3 + $0x14] sm:$0xf]  ;;  %v1363_v46 = vor.u32 %v1620_v43, %v1362_v14 }
 0x118   :  { %862 = vmatpush.bf16.msra.mxu3 %v1455_v19  ;;  %v1364_v36 = vld [vmem:[#allocation3 + $0x18] sm:$0xf0]  ;;  %v1635_v4 = vld [vmem:[#allocation3 + $0x94] sm:$0xf]  ;;  %v1427_v7 = vor.u32 %v1636_v13, %v1426_v41  ;;  %v1354_v45 = vld [vmem:[#allocation3] sm:$0xf] }
 0x119   :  { %821 = vmatpush.bf16.msra.mxu0 %v1379_v18  ;;  %v1428_v44 = vld [vmem:[#allocation3 + $0x98] sm:$0xf0]  ;;  %v1367_v38 = vor.u32 %v1619_v47, %v1364_v36  ;;  %v1618_v6 = vld [vmem:[#allocation3 + $0x4] sm:$0xf0]  ;;  %v1418_v42 = vld [vmem:[#allocation3 + $0x80] sm:$0xf] }
 0x11a   :  { %835 = vmatpush.bf16.msra.mxu1 %v1443_v57  ;;  %v1431_v39 = vor.u32 %v1635_v4, %v1428_v44  ;;  %v1634_v37 = vld [vmem:[#allocation3 + $0x84] sm:$0xf0]  ;;  %v1617_v15 = vld [vmem:[#allocation3 + $0x4] sm:$0xf]  ;;  %v1356_v33 = vld [vmem:[#allocation3 + $0x8] sm:$0xf0]  ;;  %v1355_v2 = vor.u32 %v1618_v6, %v1354_v45 }
 0x11b   :  { %849 = vmatpush.bf16.msra.mxu2 %v1383_v50  ;;  %v1633_v35 = vld [vmem:[#allocation3 + $0x84] sm:$0xf]  ;;  %v1420_v1 = vld [vmem:[#allocation3 + $0x88] sm:$0xf0]  ;;  %v1419_v0 = vor.u32 %v1634_v37, %v1418_v42  ;;  %v1359_v3 = vor.u32 %v1617_v15, %v1356_v33  ;;  %v651_v28 = vld [vmem:[%s2084_s4] sm:$0x3] }
 0x11c   :  { %863 = vmatpush.bf16.msra.mxu3 %v1447_v62  ;;  %v1423_v29 = vor.u32 %v1633_v35, %v1420_v1  ;;  %v653_v31 = vperm.slane %v651_v28, 0  ;;  %v654_v26 = vperm.slane %v651_v28, 1 }
 0x11d   :  { %822 = vmatpush.bf16.msra.mxu0 %v1371_v11 }
 0x11e   :  { %836 = vmatpush.bf16.msra.mxu1 %v1435_v10 }
 0x11f   :  { %850 = vmatpush.bf16.msra.mxu2 %v1375_v40 }
 0x120   :  { %864 = vmatpush.bf16.msra.mxu3 %v1439_v12 }
 0x121   :  { %823 = vmatpush.bf16.msra.mxu0 %v1363_v46 }
 0x122   :  { %837 = vmatpush.bf16.msra.mxu1 %v1427_v7 }
 0x123   :  { %851 = vmatpush.bf16.msra.mxu2 %v1367_v38 }
 0x124   :  { %865 = vmatpush.bf16.msra.mxu3 %v1431_v39 }
 0x125   :  { %824 = vmatpush.bf16.msra.mxu0 %v1355_v2 }
 0x126   :  { %838 = vmatpush.bf16.msra.mxu1 %v1419_v0 }
 0x127   :  { %852 = vmatpush.bf16.msra.mxu2 %v1359_v3 }
 0x128   :  { %866 = vmatpush.bf16.msra.mxu3 %v1423_v29  ;;  %825 = vmatmul.bf16.vlgmr.msra.gmra.mxu0 %v2061_v16 }
 0x129   :  { %839 = vmatmul.bf16.vlgmr.msra.gmra.mxu1 %v2063_v61 }
 0x12a   :  { %853 = vmatmul.bf16.vlgmr.msra.gmra.mxu2 %v2061_v16 }
 0x12b   :  { %867 = vmatmul.bf16.vlgmr.msra.gmra.mxu3 %v2063_v61 }
 0x1a5   :  { %v826_v30 = vpop.f32.mrf.mxu0 }
 0x1a6   :  { %v840_v25 = vpop.f32.mrf.mxu1  ;;  %v827_v27 = vadd.f32 %v826_v30, %v653_v31 }
 0x1a8   :  { %v841_v32 = vadd.f32 %v840_v25, %v827_v27 }
 0x1aa   :  { %v873_v16 = vmax.f32 %v841_v32, 0.0 }
 0x1ad   :  { %v854_v24 = vpop.f32.mrf.mxu2  ;;  %v828_v23 = vpop.f32.mrf.mxu0 }
 0x1ae   :  { %v868_v21 = vpop.f32.mrf.mxu3  ;;  %v829_v20 = vadd.f32 %v828_v23, %v653_v31  ;;  %v842_v22 = vpop.f32.mrf.mxu1  ;;  %v855_v52 = vadd.f32 %v854_v24, %v654_v26 }
 0x1b0   :  { %v843_v34 = vadd.f32 %v842_v22, %v829_v20  ;;  %v869_v19 = vadd.f32 %v868_v21, %v855_v52 }
 0x1b2   :  { %v875_v53 = vmax.f32 %v843_v34, 0.0  ;;  %v874_v49 = vmax.f32 %v869_v19, 0.0 }
 0x1b4   :  { %v877_v61 = vpack.c.bf16 %v875_v53, %v873_v16 }
 0x1b5   :  { %v856_v17 = vpop.f32.mrf.mxu2 }
 0x1b6   :  { %v857_v54 = vadd.f32 %v856_v17, %v654_v26  ;;  %v870_v55 = vpop.f32.mrf.mxu3 }
 0x1b8   :  { %v871_v56 = vadd.f32 %v870_v55, %v857_v54 }
 0x1ba   :  { %v876_v51 = vmax.f32 %v871_v56, 0.0 }
 0x1bc   :  { %v878_v18 = vpack.c.bf16 %v876_v51, %v874_v49 }
 0x1bd   :  { %1772 = dma.done.wait [#allocation7], 2048 }
 0x1be   :  { %1773 = vsyncadd [#allocation7], 4294965248  ;;  %v1656_v57 = vld [vmem:[#allocation4 + $0x38] sm:$0xff]  ;;  %v1655_v58 = vld [vmem:[#allocation4 + $0x30] sm:$0xff] }
 0x1bf   :  { %v1664_v50 = vld [vmem:[#allocation4 + $0x78] sm:$0xff]  ;;  %1014 = vmatpush.bf16.msrb.mxu0 %v1656_v57  ;;  %v1663_v59 = vld [vmem:[#allocation4 + $0x70] sm:$0xff]  ;;  %v1654_v60 = vld [vmem:[#allocation4 + $0x28] sm:$0xff] }
 0x1c0   :  { %1028 = vmatpush.bf16.msrb.mxu1 %v1664_v50  ;;  %v1662_v62 = vld [vmem:[#allocation4 + $0x68] sm:$0xff]  ;;  %v1653_v63 = vld [vmem:[#allocation4 + $0x20] sm:$0xff]  ;;  %v1652_v48 = vld [vmem:[#allocation4 + $0x18] sm:$0xff] }
 0x1c1   :  { %v1661_v5 = vld [vmem:[#allocation4 + $0x60] sm:$0xff]  ;;  %v1660_v9 = vld [vmem:[#allocation4 + $0x58] sm:$0xff]  ;;  %v1651_v8 = vld [vmem:[#allocation4 + $0x10] sm:$0xff] }
 0x1c2   :  { %v1659_v11 = vld [vmem:[#allocation4 + $0x50] sm:$0xff]  ;;  %v1650_v10 = vld [vmem:[#allocation4 + $0x8] sm:$0xff]  ;;  %v1649_v14 = vld [vmem:[#allocation4] sm:$0xff] }
 0x1c3   :  { %1015 = vmatpush.bf16.msrb.mxu0 %v1655_v58  ;;  %v1658_v40 = vld [vmem:[#allocation4 + $0x48] sm:$0xff]  ;;  %v1657_v43 = vld [vmem:[#allocation4 + $0x40] sm:$0xff] }
 0x1c4   :  { %1029 = vmatpush.bf16.msrb.mxu1 %v1663_v59  ;;  %v1669_v41 = vld [vmem:[%s2085_s6] ss:$0 sm:$0xff] }
 0x1c7   :  { %1016 = vmatpush.bf16.msrb.mxu0 %v1654_v60 }
 0x1c8   :  { %1030 = vmatpush.bf16.msrb.mxu1 %v1662_v62 }
 0x1cb   :  { %1017 = vmatpush.bf16.msrb.mxu0 %v1653_v63 }
 0x1cc   :  { %1031 = vmatpush.bf16.msrb.mxu1 %v1661_v5 }
 0x1cf   :  { %1018 = vmatpush.bf16.msrb.mxu0 %v1652_v48 }
 0x1d0   :  { %1032 = vmatpush.bf16.msrb.mxu1 %v1660_v9 }
 0x1d3   :  { %1019 = vmatpush.bf16.msrb.mxu0 %v1651_v8 }
 0x1d4   :  { %1033 = vmatpush.bf16.msrb.mxu1 %v1659_v11 }
 0x1d7   :  { %1020 = vmatpush.bf16.msrb.mxu0 %v1650_v10 }
 0x1d8   :  { %1034 = vmatpush.bf16.msrb.mxu1 %v1658_v40 }
 0x1db   :  { %1021 = vmatpush.bf16.msrb.mxu0 %v1649_v14 }
 0x1dc   :  { %1035 = vmatpush.bf16.msrb.mxu1 %v1657_v43 }
 0x1de   :  { %1022 = vmatmul.bf16.vlgmr.msrb.gmra.mxu0 %v877_v61 }
 0x1df   :  { %1036 = vmatmul.bf16.vlgmr.msrb.gmra.mxu1 %v878_v18 }
 0x25b   :  { %v1023_v12 = vpop.f32.mrf.mxu0 }
 0x25c   :  { %v1037_v13 = vpop.f32.mrf.mxu1  ;;  %v1024_v47 = vadd.f32 %v1669_v41, %v1023_v12 }
 0x25e   :  { %v1038_v36 = vadd.f32 %v1037_v13, %v1024_v47 }
 0x260   :  { %1042 = vst [vmem:[%s2086_s7] sm:$0xff] %v1038_v36 }
 0x263   :  { %v1025_v4 = vpop.f32.mrf.mxu0 }
 0x264   :  { %v1026_v44 = vadd.f32 %v1669_v41, %v1025_v4  ;;  %v1039_v46 = vpop.f32.mrf.mxu1 }
 0x266   :  { %v1040_v7 = vadd.f32 %v1039_v46, %v1026_v44 }
 0x268   :  { %1043 = vst [vmem:[%s2086_s7 + $0x8] sm:$0xff] %v1040_v7 }
 0x269   :  { %1048 = vsyncmov [#allocation5] }
 0x26c   :  { %s1049_s18 = vpop.sfrf %1048 }
 0x26d   :  { %p1544_p0 = scmp.ne.s32.totalorder %s1049_s18, 0 }
 0x26f   :  { %1053 = shalt.err (%p1544_p0)  }
 0x270   :  { %1055 = vsyncmov [#allocation5 + $0x1] }
 0x273   :  { %s1056_s6 = vpop.sfrf %1055 }
 0x274   :  { %p1545_p1 = scmp.ne.s32.totalorder %s1056_s6, 0 }
 0x276   :  { %1060 = shalt.err (%p1545_p1)  }
 0x277   :  { %1061 = vsyncmov [#allocation6] }
 0x27a   :  { %s1062_s19 = vpop.sfrf %1061 }
 0x27b   :  { %p1546_p2 = scmp.ne.s32.totalorder %s1062_s19, 0 }
 0x27d   :  { %1066 = shalt.err (%p1546_p2)  }
 0x27e   :  { %1068 = vsyncmov [#allocation6 + $0x1] }
 0x281   :  { %s1069_s20 = vpop.sfrf %1068 }
 0x282   :  { %p1547_p3 = scmp.ne.s32.totalorder %s1069_s20, 0 }
 0x284   :  { %1073 = shalt.err (%p1547_p3)  }
 0x285   :  { %1074 = vsyncmov [#allocation7] }
 0x288   :  { %s1075_s21 = vpop.sfrf %1074 }
 0x289   :  { %p1548_p4 = scmp.ne.s32.totalorder %s1075_s21, 0 }
 0x28b   :  { %1079 = shalt.err (%p1548_p4)  }

</bundles_post_ra>
